<compile_context>
chip_gen: v7x
topology: tpu7x:2x2x1
jax: 0.10.0
libtpu: 0.0.40
codegen_flags: <defaults>
</compile_context>

<pallas_src>
import functools

import jax
import jax.numpy as jnp
from jax.experimental import pallas as pl
from jax.experimental.pallas import tpu as pltpu


def _round_up(x, m):
    return ((x + m - 1) // m) * m


def _sigmoid(z, approx):
    if approx:
        # exp on the EUP, approximate reciprocal on the EUP -> divide off VALU.
        return pl.reciprocal(1.0 + jnp.exp(-z), approx=True)
    return 1.0 / (1.0 + jnp.exp(-z))


def _packed_kernel(x_ref, w1_ref, b1_ref, w2_ref, b2_ref, w3_ref, b3_ref,
                   o_ref, *, approx_sigmoid):
    """Lane-dense path.

    x_ref:  (tm_p, pack*in)  -- pack batch rows per 128-lane row
    w1_ref: (pack*in,  pack*h1)  block-diagonal
    w2_ref: (pack*h1,  pack*h2)  block-diagonal
    w3_ref: (pack*h2,  pack)     block-diagonal column replication (f32)
    b3_ref: (1, 1) scalar in SMEM
    o_ref:  (tm_p, pack)
    """
    cdt = w1_ref.dtype                      # f32 or bf16 (chosen wrapper-side)

    # fc1 + ReLU (MXU, K = pack*in = 128, f32 accumulate; bias/ReLU in f32).
    h1 = jnp.dot(x_ref[...].astype(cdt), w1_ref[...],
                 preferred_element_type=jnp.float32)
    h1 = jnp.maximum(h1 + b1_ref[...], 0.0)

    # fc2 + ReLU.
    h2 = jnp.dot(h1.astype(cdt), w2_ref[...],
                 preferred_element_type=jnp.float32)
    h2 = jnp.maximum(h2 + b2_ref[...], 0.0)

    # out layer folded into a block-diagonal (pack*h2, pack) reduction (f32).
    z = jnp.dot(h2, w3_ref[...], preferred_element_type=jnp.float32) + b3_ref[0, 0]
    o_ref[...] = _sigmoid(z, approx_sigmoid).astype(o_ref.dtype)


def _row_kernel(x_ref, w1_ref, b1_ref, w2_ref, b2_ref, w3_ref, b3_ref,
                o_ref, *, approx_sigmoid):
    """Generic fallback: one batch row per sublane; lane-dense (1, tm) output."""
    cdt = w1_ref.dtype

    h1 = jnp.dot(x_ref[...].astype(cdt), w1_ref[...],
                 preferred_element_type=jnp.float32)
    h1 = jnp.maximum(h1 + b1_ref[...], 0.0)

    h2 = jnp.dot(h1.astype(cdt), w2_ref[...],
                 preferred_element_type=jnp.float32)
    h2 = jnp.maximum(h2 + b2_ref[...], 0.0)

    # out_features == 1 -> VPU multiply + lane reduce instead of an N=1 matmul.
    z = jnp.sum(h2 * w3_ref[...], axis=-1) + b3_ref[0, 0]        # (tm,)
    o_ref[0, :] = _sigmoid(z, approx_sigmoid).astype(o_ref.dtype)


def adaptive_neural_net(x, params, *, block_batch=8192, use_bf16_dots=False):
    """Forward pass of AdaptiveNeuralNet.

    x: (B, input_size).  params: w1 (in,32), b1 (1,32), w2 (32,16), b2 (1,16),
    w3 (1,16) row, b3 (1,1)  (fc weights stored transposed w.r.t. nn.Linear).
    Returns (B, 1) float32.
    """
    assert block_batch % 128 == 0 and block_batch > 0
    B, in_features = x.shape
    w1, b1 = params["w1"], params["b1"]
    w2, b2 = params["w2"], params["b2"]
    w3, b3 = params["w3"], params["b3"]
    h1_dim, h2_dim = w1.shape[1], w2.shape[1]

    cdt = jnp.bfloat16 if use_bf16_dots else jnp.float32
    cparams = pltpu.CompilerParams(
        dimension_semantics=("parallel",),          # batch tiles across v7x TCs
        # Big batch tiles need more than the default scoped-VMEM limit
        # (16 MiB v5e / 32 MiB v6e,v7x); 48 MiB fits under every generation's
        # physical VMEM (64 MiB v7x, 128 MiB v5e/v6e).
        vmem_limit_bytes=48 * 1024 * 1024,
    )
    smem_spec = pl.BlockSpec(memory_space=pltpu.MemorySpace.SMEM)   # b3 scalar

    pack = 128 // in_features if (in_features <= 128 and 128 % in_features == 0) else 1

    if pack > 1 and B % pack == 0:
        # ---------------- lane-dense packed path ----------------
        bp = B // pack
        xp = x.reshape(bp, pack * in_features)        # free row-major reshape
        eye = jnp.eye(pack, dtype=jnp.float32)
        # Block-diagonal weight replications (tiny, built once wrapper-side).
        w1bd = jnp.kron(eye, w1).astype(cdt)                        # (pack*in,  pack*h1)
        w2bd = jnp.kron(eye, w2).astype(cdt)                        # (pack*h1,  pack*h2)
        w3bd = jnp.kron(eye, w3.reshape(h2_dim, 1)).astype(jnp.float32)  # (pack*h2, pack)
        b1t = jnp.tile(b1, (1, pack))                               # (1, pack*h1)
        b2t = jnp.tile(b2, (1, pack))                               # (1, pack*h2)

        tm_p = max(8, min(block_batch // pack, _round_up(bp, 8)))
        tm_p = _round_up(tm_p, 8)
        grid = (pl.cdiv(bp, tm_p),)

        out = pl.pallas_call(
            functools.partial(_packed_kernel, approx_sigmoid=use_bf16_dots),
            out_shape=jax.ShapeDtypeStruct((bp, pack), jnp.float32),
            grid=grid,
            in_specs=[
                # x: tiled over batch grid axis, double-buffered, lane-dense.
                pl.BlockSpec((tm_p, pack * in_features), lambda i: (i, 0)),
                # Weights/biases: constant index maps -> resident in VMEM.
                pl.BlockSpec((pack * in_features, pack * h1_dim), lambda i: (0, 0)),
                pl.BlockSpec((1, pack * h1_dim), lambda i: (0, 0)),
                pl.BlockSpec((pack * h1_dim, pack * h2_dim), lambda i: (0, 0)),
                pl.BlockSpec((1, pack * h2_dim), lambda i: (0, 0)),
                pl.BlockSpec((pack * h2_dim, pack), lambda i: (0, 0)),
                smem_spec,
            ],
            out_specs=pl.BlockSpec((tm_p, pack), lambda i: (i, 0)),
            compiler_params=cparams,
        )(xp, w1bd, b1t, w2bd, b2t, w3bd, b3)
        return out.reshape(B, 1)                      # free row-major reshape

    # ---------------- generic row-per-batch fallback ----------------
    tm = max(128, min(block_batch, _round_up(B, 128)))
    grid = (pl.cdiv(B, tm),)
    out_row = pl.pallas_call(
        functools.partial(_row_kernel, approx_sigmoid=use_bf16_dots),
        out_shape=jax.ShapeDtypeStruct((1, B), jnp.float32),
        grid=grid,
        in_specs=[
            pl.BlockSpec((tm, in_features), lambda i: (i, 0)),   # partial last tile OK
            pl.BlockSpec((in_features, h1_dim), lambda i: (0, 0)),
            pl.BlockSpec((1, h1_dim), lambda i: (0, 0)),
            pl.BlockSpec((h1_dim, h2_dim), lambda i: (0, 0)),
            pl.BlockSpec((1, h2_dim), lambda i: (0, 0)),
            pl.BlockSpec((1, h2_dim), lambda i: (0, 0)),         # w3 as a (1, 16) row
            smem_spec,
        ],
        # Lane-dense output: each grid step writes a (1, tm) slab of one row.
        out_specs=pl.BlockSpec((1, tm), lambda i: (0, i)),
        compiler_params=cparams,
    )(x, w1.astype(cdt), b1, w2.astype(cdt), b2, w3, b3)
    return out_row.reshape(B, 1)


def init_params(key, input_size):
    """Deterministic init mimicking PyTorch nn.Linear defaults."""
    def linear(key, fan_in, fan_out):
        kw, kb = jax.random.split(key)
        bound = 1.0 / jnp.sqrt(fan_in)
        w = jax.random.uniform(kw, (fan_in, fan_out), jnp.float32, -bound, bound)
        b = jax.random.uniform(kb, (1, fan_out), jnp.float32, -bound, bound)
        return w, b

    k1, k2, k3 = jax.random.split(key, 3)
    w1, b1 = linear(k1, input_size, 32)
    w2, b2 = linear(k2, 32, 16)
    w3, b3 = linear(k3, 16, 1)            # (16, 1), (1, 1)
    return {"w1": w1, "b1": b1, "w2": w2, "b2": b2,
            "w3": w3.T, "b3": b3}         # w3 stored as a (1, 16) row


def reference(x, p):
    hp = jax.lax.Precision.HIGHEST
    h1 = jnp.maximum(jnp.dot(x, p["w1"], precision=hp) + p["b1"], 0.0)
    h2 = jnp.maximum(jnp.dot(h1, p["w2"], precision=hp) + p["b2"], 0.0)
    z = jnp.dot(h2, p["w3"].T, precision=hp) + p["b3"]
    return 1.0 / (1.0 + jnp.exp(-z))


if __name__ == "__main__":
    key = jax.random.PRNGKey(0)
    kx, kp = jax.random.split(key)

    batch, input_size = 8, 16
    x = jax.random.normal(kx, (batch, input_size), jnp.float32)
    params = init_params(kp, input_size)

    ref = reference(x, params)

    # f32 path (exact sigmoid, f32 MXU operands) -> packed lane-dense path.
    # Tolerance allows for MXU f32 pass-count differences vs the XLA reference.
    out_f32 = jax.block_until_ready(
        adaptive_neural_net(x, params, use_bf16_dots=False))
    assert out_f32.shape == (batch, 1), out_f32.shape
    assert jnp.allclose(out_f32, ref, atol=2e-3, rtol=2e-3), (out_f32, ref)

    # Perf variant: in-kernel bf16 MXU operands + approx-reciprocal sigmoid.
    out_bf16 = jax.block_until_ready(
        adaptive_neural_net(x, params, use_bf16_dots=True))
    assert out_bf16.shape == (batch, 1), out_bf16.shape
    assert jnp.allclose(out_bf16, ref, atol=3e-2, rtol=3e-2), (out_bf16, ref)

    # Ragged batch (not a multiple of pack) -> generic fallback, no jnp.pad,
    # partial last tile handled by masked output stores.
    x_ragged = x[:5]
    out_ragged = jax.block_until_ready(adaptive_neural_net(x_ragged, params))
    assert out_ragged.shape == (5, 1), out_ragged.shape
    assert jnp.allclose(out_ragged, ref[:5], atol=2e-3, rtol=2e-3), (out_ragged, ref[:5])

    print("KERNEL_OK")
</pallas_src>

<mosaic_0001>
module attributes {stable_mosaic.version = 11 : i64} {
  func.func @_packed_kernel(%arg0: i32, %arg1: memref<8x128xf32, #tpu.memory_space<vmem>>, %arg2: memref<128x256xf32, #tpu.memory_space<vmem>>, %arg3: memref<1x256xf32, #tpu.memory_space<vmem>>, %arg4: memref<256x128xf32, #tpu.memory_space<vmem>>, %arg5: memref<1x128xf32, #tpu.memory_space<vmem>>, %arg6: memref<128x8xf32, #tpu.memory_space<vmem>>, %arg7: memref<1x1xf32, #tpu.memory_space<smem>>, %arg8: memref<8x8xf32, #tpu.memory_space<vmem>>) attributes {dimension_semantics = [#tpu.dimension_semantics<parallel>], iteration_bounds = array<i64: 1>, scalar_prefetch = 0 : i64, scratch_operands = 0 : i64, tpu.core_type = #tpu.core_type<tc>, window_params = [{transform_indices = @transform_0, window_bounds = array<i64: 8, 128>}, {pipeline_mode = #tpu.pipeline_mode<synchronous>, transform_indices = @transform_1, window_bounds = array<i64: 128, 256>}, {pipeline_mode = #tpu.pipeline_mode<synchronous>, transform_indices = @transform_2, window_bounds = array<i64: 1, 256>}, {pipeline_mode = #tpu.pipeline_mode<synchronous>, transform_indices = @transform_3, window_bounds = array<i64: 256, 128>}, {pipeline_mode = #tpu.pipeline_mode<synchronous>, transform_indices = @transform_4, window_bounds = array<i64: 1, 128>}, {pipeline_mode = #tpu.pipeline_mode<synchronous>, transform_indices = @transform_5, window_bounds = array<i64: 128, 8>}, {transform_indices = @transform_6, window_bounds = array<i64: 1, 1>}, {transform_indices = @transform_7, window_bounds = array<i64: 8, 8>}]} {
    %c0 = arith.constant 0 : index
    %c0_0 = arith.constant 0 : index
    %0 = vector.load %arg1[%c0, %c0_0] : memref<8x128xf32, #tpu.memory_space<vmem>>, vector<8x128xf32>
    %c0_1 = arith.constant 0 : index
    %c0_2 = arith.constant 0 : index
    %1 = vector.load %arg2[%c0_1, %c0_2] : memref<128x256xf32, #tpu.memory_space<vmem>>, vector<128x256xf32>
    %cst = arith.constant dense<0.000000e+00> : vector<8x256xf32>
    %2 = tpu.matmul %0, %1, %cst {dimension_numbers = #tpu.dot_dimension_numbers<[1], [0], [0], [1], [0, 0, 1, 1], [], []>} : vector<8x128xf32>, vector<128x256xf32>, vector<8x256xf32> -> vector<8x256xf32>
    %c0_3 = arith.constant 0 : index
    %c0_4 = arith.constant 0 : index
    %3 = vector.load %arg3[%c0_3, %c0_4] : memref<1x256xf32, #tpu.memory_space<vmem>>, vector<1x256xf32>
    %4 = vector.broadcast %3 : vector<1x256xf32> to vector<8x256xf32>
    %5 = arith.addf %2, %4 : vector<8x256xf32>
    %cst_5 = arith.constant 0.000000e+00 : f32
    %6 = vector.broadcast %cst_5 : f32 to vector<8x256xf32>
    %7 = arith.maximumf %5, %6 : vector<8x256xf32>
    %c0_6 = arith.constant 0 : index
    %c0_7 = arith.constant 0 : index
    %8 = vector.load %arg4[%c0_6, %c0_7] : memref<256x128xf32, #tpu.memory_space<vmem>>, vector<256x128xf32>
    %cst_8 = arith.constant dense<0.000000e+00> : vector<8x128xf32>
    %9 = tpu.matmul %7, %8, %cst_8 {dimension_numbers = #tpu.dot_dimension_numbers<[1], [0], [0], [1], [0, 0, 1, 1], [], []>} : vector<8x256xf32>, vector<256x128xf32>, vector<8x128xf32> -> vector<8x128xf32>
    %c0_9 = arith.constant 0 : index
    %c0_10 = arith.constant 0 : index
    %10 = vector.load %arg5[%c0_9, %c0_10] : memref<1x128xf32, #tpu.memory_space<vmem>>, vector<1x128xf32>
    %11 = vector.broadcast %10 : vector<1x128xf32> to vector<8x128xf32>
    %12 = arith.addf %9, %11 : vector<8x128xf32>
    %cst_11 = arith.constant 0.000000e+00 : f32
    %13 = vector.broadcast %cst_11 : f32 to vector<8x128xf32>
    %14 = arith.maximumf %12, %13 : vector<8x128xf32>
    %c0_12 = arith.constant 0 : index
    %c0_13 = arith.constant 0 : index
    %15 = vector.load %arg6[%c0_12, %c0_13] : memref<128x8xf32, #tpu.memory_space<vmem>>, vector<128x8xf32>
    %cst_14 = arith.constant dense<0.000000e+00> : vector<8x8xf32>
    %16 = tpu.matmul %14, %15, %cst_14 {dimension_numbers = #tpu.dot_dimension_numbers<[1], [0], [0], [1], [0, 0, 1, 1], [], []>} : vector<8x128xf32>, vector<128x8xf32>, vector<8x8xf32> -> vector<8x8xf32>
    %c0_15 = arith.constant 0 : index
    %c0_16 = arith.constant 0 : index
    %17 = memref.load %arg7[%c0_15, %c0_16] : memref<1x1xf32, #tpu.memory_space<smem>>
    %18 = vector.broadcast %17 : f32 to vector<8x8xf32>
    %19 = arith.addf %16, %18 : vector<8x8xf32>
    %cst_17 = arith.constant 0.000000e+00 : f32
    %20 = vector.broadcast %cst_17 : f32 to vector<8x8xf32>
    %21 = arith.subf %20, %19 : vector<8x8xf32>
    %22 = math.exp %21 : vector<8x8xf32>
    %cst_18 = arith.constant 1.000000e+00 : f32
    %23 = vector.broadcast %cst_18 : f32 to vector<8x8xf32>
    %24 = arith.addf %23, %22 : vector<8x8xf32>
    %cst_19 = arith.constant 1.000000e+00 : f32
    %25 = vector.broadcast %cst_19 : f32 to vector<8x8xf32>
    %26 = arith.divf %25, %24 : vector<8x8xf32>
    %c0_20 = arith.constant 0 : index
    %c0_21 = arith.constant 0 : index
    %27 = vector.load %arg8[%c0_20, %c0_21] : memref<8x8xf32, #tpu.memory_space<vmem>>, vector<8x8xf32>
    tpu.vector_store %arg8[%c0_20, %c0_21], %26 {strides = array<i32>} : memref<8x8xf32, #tpu.memory_space<vmem>>, vector<8x8xf32>,
    return
  }
  func.func @transform_0(%arg0: i32) -> (i32, i32) {
    %c0_i32 = arith.constant 0 : i32
    %c0_i32_0 = arith.constant 0 : i32
    return %arg0, %c0_i32 : i32, i32
  }
  func.func @transform_1(%arg0: i32) -> (i32, i32) {
    %c0_i32 = arith.constant 0 : i32
    %c0_i32_0 = arith.constant 0 : i32
    %c0_i32_1 = arith.constant 0 : i32
    return %c0_i32, %c0_i32_0 : i32, i32
  }
  func.func @transform_2(%arg0: i32) -> (i32, i32) {
    %c0_i32 = arith.constant 0 : i32
    %c0_i32_0 = arith.constant 0 : i32
    %c0_i32_1 = arith.constant 0 : i32
    return %c0_i32, %c0_i32_0 : i32, i32
  }
  func.func @transform_3(%arg0: i32) -> (i32, i32) {
    %c0_i32 = arith.constant 0 : i32
    %c0_i32_0 = arith.constant 0 : i32
    %c0_i32_1 = arith.constant 0 : i32
    return %c0_i32, %c0_i32_0 : i32, i32
  }
  func.func @transform_4(%arg0: i32) -> (i32, i32) {
    %c0_i32 = arith.constant 0 : i32
    %c0_i32_0 = arith.constant 0 : i32
    %c0_i32_1 = arith.constant 0 : i32
    return %c0_i32, %c0_i32_0 : i32, i32
  }
  func.func @transform_5(%arg0: i32) -> (i32, i32) {
    %c0_i32 = arith.constant 0 : i32
    %c0_i32_0 = arith.constant 0 : i32
    %c0_i32_1 = arith.constant 0 : i32
    return %c0_i32, %c0_i32_0 : i32, i32
  }
  func.func @transform_6(%arg0: i32) -> (i32, i32) {
    %c0_i32 = arith.constant 0 : i32
    %c0_i32_0 = arith.constant 0 : i32
    %c0_i32_1 = arith.constant 0 : i32
    return %c0_i32, %c0_i32_0 : i32, i32
  }
  func.func @transform_7(%arg0: i32) -> (i32, i32) {
    %c0_i32 = arith.constant 0 : i32
    %c0_i32_0 = arith.constant 0 : i32
    return %arg0, %c0_i32 : i32, i32
  }
}

</mosaic_0001>

<bundles_post_ra>
// kernel: tpu_custom_call.1
= control target key start
LH: loop header
LB: loop body
LE: loop exit
PB: predicated region body
PF: predicated region fallthrough
CT: control target
= control target key end

     0   :  { %13 = vsyncpa [#allocation4], 0  ;;  %s813_s0 = inlined_call_operand.vmem [shape: f32[1,128], index: 0, kind: input, shape index: {}]   ;;  %s814_s1 = inlined_call_operand.hbm [shape: f32[128,256], index: 1, kind: input, shape index: {}]   ;;  %s815_s2 = inlined_call_operand.vmem [shape: f32[1,256], index: 2, kind: input, shape index: {}]   ;;  %s816_s3 = inlined_call_operand.hbm [shape: f32[256,128], index: 3, kind: input, shape index: {}]   ;;  %s817_s4 = inlined_call_operand.vmem [shape: f32[1,128], index: 4, kind: input, shape index: {}]   ;;  %s818_s5 = inlined_call_operand.vmem [shape: f32[128,8], index: 5, kind: input, shape index: {}]   ;;  %s819_s6 = inlined_call_operand.<no memory space> [shape: f32[1,1], index: 6, kind: input, shape index: {}]   ;;  %s820_s7 = inlined_call_operand.hbm [shape: f32[1,8], index: 7, kind: output, shape index: {}]  }
   0x1   :  { %14 = vsyncpa [#allocation7], 0 }
   0x2   :  { %15 = vsyncpa [#allocation5], 0  ;;  %s661_s24 = smov [#allocation3]   ;;  %s589_s28 = scalar_lea.hbm %s814_s1, 4096 }
   0x3   :  { %s23_s25 = sshll.u32 %s661_s24, 4  ;;  %p590_p0 = scmp.ne.s32.totalorder %s814_s1, %s589_s28  ;;  %s24_s25 = int_to_ptr.vmem [resolvable:$true] %s23_s25 }
   0x4   :  { %p593_p1 = scmp.lt.u32.totalorder %s589_s28, %s814_s1 }
   0x6   :  { %p595_p2 = pnand %p593_p1, %p590_p0 }
   0x8   :  { %598 = shalt.err (!%p595_p2)
}
   0x9   :  { %s599_s10 = scalar_lea.vmem %s24_s25, 4096  ;;  %p604_p4 = scmp.lt.s32.totalorder %s24_s25, %s24_s25 }
   0xa   :  { %p600_p3 = scmp.ne.s32.totalorder %s24_s25, %s599_s10  ;;  %p605_p5 = scmp.lt.s32.totalorder %s599_s10, %s599_s10 }
   0xc   :  { %p606_p6 = por %p605_p5, %p604_p4 }
   0xe   :  { %p607_p7 = pnand %p606_p6, %p600_p3 }
  0x10   :  { %610 = shalt.err (!%p607_p7)
}
  0x11   :  { %s662_s11 = smov 256   ;;  %s663_s12 = smov 16  }
  0x12   :  { %29 = dma.hbm_to_vmem [thread:$0]  %s814_s1, 4096, %s24_s25, [#allocation4], %s662_s11, %s662_s11, %s663_s12  }
  0x13   :  { %s664_s15 = smov [#allocation6]   ;;  %s611_s19 = scalar_lea.hbm %s816_s3, 4096 }
  0x14   :  { %s37_s16 = sshll.u32 %s664_s15, 4  ;;  %p612_p8 = scmp.ne.s32.totalorder %s816_s3, %s611_s19  ;;  %s38_s16 = int_to_ptr.vmem [resolvable:$true] %s37_s16 }
  0x15   :  { %p615_p9 = scmp.lt.u32.totalorder %s611_s19, %s816_s3 }
  0x17   :  { %p617_p10 = pnand %p615_p9, %p612_p8 }
  0x19   :  { %620 = shalt.err (!%p617_p10)
}
  0x1a   :  { %s621_s24 = scalar_lea.vmem %s38_s16, 4096  ;;  %p626_p12 = scmp.lt.s32.totalorder %s38_s16, %s38_s16 }
  0x1b   :  { %p622_p11 = scmp.ne.s32.totalorder %s38_s16, %s621_s24  ;;  %p627_p13 = scmp.lt.s32.totalorder %s621_s24, %s621_s24 }
  0x1d   :  { %p628_p0 = por %p627_p13, %p626_p12 }
  0x1f   :  { %p629_p1 = pnand %p628_p0, %p622_p11 }
  0x21   :  { %632 = shalt.err (!%p629_p1)
}
  0x22   :  { %s665_s1 = smov 128   ;;  %s666_s25 = smov 8  }
  0x23   :  { %43 = dma.hbm_to_vmem [thread:$0]  %s816_s3, 4096, %s38_s16, [#allocation7], %s665_s1, %s665_s1, %s666_s25  }
  0x24   :  { %655 = dma.done.wait [#allocation4], 4096  }
  0x25   :  { %656 = vsyncadd [#allocation4], 4294963200 }
  0x26   :  { %657 = dma.done.wait [#allocation7], 4096  }
  0x27   :  { %658 = vsyncadd [#allocation7], 4294963200  ;;  %v667_v0 = vmov 0.0   ;;  %v58_v1 = vld [vmem:[#allocation3 + $0x8] sm:$0xff]  ;;  %v60_v2 = vld [vmem:[#allocation3 + $0x18] sm:$0xff]  ;;  %vm669_vm0 = vmmov 0  }
  0x28   :  { %165 = vmatprep.mubr.f32.mxu0 %v667_v0  ;;  %v57_v3 = vld [vmem:[#allocation3] sm:$0xff]  ;;  %v486_v4 = vpack.c.bf16 %v60_v2, %v58_v1  ;;  %v59_v5 = vld [vmem:[#allocation3 + $0x10] sm:$0xff]  ;;  %v62_v6 = vld [vmem:[#allocation3 + $0x28] sm:$0xff]  ;;  %vm378_vm1 = vcmask 64512  }
  0x29   :  { %v64_v7 = vld [vmem:[#allocation3 + $0x38] sm:$0xff]  ;;  %v488_v8 = vpack.c.bf16 %v59_v5, %v57_v3  ;;  %v61_v10 = vld [vmem:[#allocation3 + $0x20] sm:$0xff]  ;;  %v63_v11 = vld [vmem:[#allocation3 + $0x30] sm:$0xff] }
  0x2a   :  { %v490_v9 = vpack.c.bf16 %v64_v7, %v62_v6  ;;  %v66_v12 = vld [vmem:[#allocation3 + $0x48] sm:$0xff]  ;;  %487 = vmatprep.subr.bf16.mxu0 %v486_v4  ;;  %v68_v13 = vld [vmem:[#allocation3 + $0x58] sm:$0xff]  ;;  %v492_v14 = vpack.c.bf16 %v63_v11, %v61_v10  ;;  %v65_v16 = vld [vmem:[#allocation3 + $0x40] sm:$0xff] }
  0x2b   :  { %489 = vmatpush1.bf16.msra.mxu0 %v488_v8  ;;  %v494_v15 = vpack.c.bf16 %v68_v13, %v66_v12  ;;  %v67_v17 = vld [vmem:[#allocation3 + $0x50] sm:$0xff]  ;;  %v70_v18 = vld [vmem:[#allocation3 + $0x68] sm:$0xff]  ;;  %v72_v19 = vld [vmem:[#allocation3 + $0x78] sm:$0xff] }
  0x2c   :  { %491 = vmatprep.subr.bf16.mxu0 %v490_v9  ;;  %v496_v20 = vpack.c.bf16 %v67_v17, %v65_v16  ;;  %v498_v21 = vpack.c.bf16 %v72_v19, %v70_v18  ;;  %v69_v22 = vld [vmem:[#allocation3 + $0x60] sm:$0xff]  ;;  %v71_v23 = vld [vmem:[#allocation3 + $0x70] sm:$0xff]  ;;  %v74_v24 = vld [vmem:[#allocation3 + $0x88] sm:$0xff] }
  0x2d   :  { %v76_v25 = vld [vmem:[#allocation3 + $0x98] sm:$0xff]  ;;  %v73_v26 = vld [vmem:[#allocation3 + $0x80] sm:$0xff]  ;;  %v75_v27 = vld [vmem:[#allocation3 + $0x90] sm:$0xff]  ;;  %v500_v31 = vpack.c.bf16 %v71_v23, %v69_v22 }
  0x2e   :  { %v190_v28 = vld [vmem:[#allocation6 + $0x80] sm:$0xff]  ;;  %v191_v29 = vld [vmem:[#allocation6 + $0x88] sm:$0xff]  ;;  %v192_v34 = vld [vmem:[#allocation6 + $0x90] sm:$0xff]  ;;  %v502_v36 = vpack.c.bf16 %v76_v25, %v74_v24  ;;  %v504_v46 = vpack.c.bf16 %v75_v27, %v73_v26 }
  0x2f   :  { %493 = vmatpush1.bf16.msra.mxu0 %v492_v14  ;;  %v174_v30 = vld [vmem:[#allocation6] sm:$0xff]  ;;  %v518_v32 = vpack.c.bf16 %v191_v29, %v190_v28  ;;  %v175_v33 = vld [vmem:[#allocation6 + $0x8] sm:$0xff]  ;;  %v193_v35 = vld [vmem:[#allocation6 + $0x98] sm:$0xff] }
  0x30   :  { %495 = vmatprep.subr.bf16.mxu0 %v494_v15  ;;  %v520_v37 = vpack.c.bf16 %v175_v33, %v174_v30  ;;  %v522_v38 = vpack.c.bf16 %v193_v35, %v192_v34  ;;  %v176_v39 = vld [vmem:[#allocation6 + $0x10] sm:$0xff]  ;;  %v177_v40 = vld [vmem:[#allocation6 + $0x18] sm:$0xff]  ;;  %v194_v41 = vld [vmem:[#allocation6 + $0xa0] sm:$0xff] }
  0x31   :  { %v78_v42 = vld [vmem:[#allocation3 + $0xa8] sm:$0xff]  ;;  %v80_v43 = vld [vmem:[#allocation3 + $0xb8] sm:$0xff]  ;;  %519 = vmatprep.subr.bf16.mxu1 %v518_v32  ;;  %v524_v45 = vpack.c.bf16 %v177_v40, %v176_v39  ;;  %v77_v47 = vld [vmem:[#allocation3 + $0xa0] sm:$0xff] }
  0x32   :  { %v195_v44 = vld [vmem:[#allocation6 + $0xa8] sm:$0xff]  ;;  %521 = vmatpush3.bf16.msra.mxu1 %v520_v37  ;;  %v178_v49 = vld [vmem:[#allocation6 + $0x20] sm:$0xff]  ;;  %v506_v51 = vpack.c.bf16 %v80_v43, %v78_v42  ;;  %v79_v52 = vld [vmem:[#allocation3 + $0xb0] sm:$0xff] }
  0x33   :  { %497 = vmatpush1.bf16.msra.mxu0 %v496_v20  ;;  %523 = vmatprep.subr.bf16.mxu1 %v522_v38  ;;  %v526_v48 = vpack.c.bf16 %v195_v44, %v194_v41  ;;  %v179_v50 = vld [vmem:[#allocation6 + $0x28] sm:$0xff]  ;;  %v196_v53 = vld [vmem:[#allocation6 + $0xb0] sm:$0xff]  ;;  %v197_v54 = vld [vmem:[#allocation6 + $0xb8] sm:$0xff]  ;;  %v508_v58 = vpack.c.bf16 %v79_v52, %v77_v47  ;;  %v668_v38 = vmov 0.0|0.0  }
  0x34   :  { %499 = vmatprep.subr.bf16.mxu0 %v498_v21  ;;  %v82_v55 = vld [vmem:[#allocation3 + $0xc8] sm:$0xff]  ;;  %v84_v56 = vld [vmem:[#allocation3 + $0xd8] sm:$0xff]  ;;  %v528_v57 = vpack.c.bf16 %v179_v50, %v178_v49  ;;  %v81_v59 = vld [vmem:[#allocation3 + $0xc0] sm:$0xff]  ;;  %v530_v60 = vpack.c.bf16 %v197_v54, %v196_v53  ;;  %v91_v54 = vlaneseq }
  0x35   :  { %v180_v61 = vld [vmem:[#allocation6 + $0x30] sm:$0xff]  ;;  %v181_v62 = vld [vmem:[#allocation6 + $0x38] sm:$0xff]  ;;  %v510_v63 = vpack.c.bf16 %v84_v56, %v82_v55  ;;  %v198_v2 = vld [vmem:[#allocation6 + $0xc0] sm:$0xff] }
  0x36   :  { %525 = vmatpush3.bf16.msra.mxu1 %v524_v45  ;;  %v83_v1 = vld [vmem:[#allocation3 + $0xd0] sm:$0xff]  ;;  %v199_v3 = vld [vmem:[#allocation6 + $0xc8] sm:$0xff]  ;;  %v88_v5 = vld [vmem:[#allocation3 + $0xf8] sm:$0xff]  ;;  %v532_v6 = vpack.c.bf16 %v181_v62, %v180_v61  ;;  %v92_v55 = vshrl.u32 %v91_v54, 7 }
  0x37   :  { %501 = vmatpush1.bf16.msra.mxu0 %v500_v31  ;;  %527 = vmatprep.subr.bf16.mxu1 %v526_v48  ;;  %v86_v4 = vld [vmem:[#allocation3 + $0xe8] sm:$0xff]  ;;  %v512_v7 = vpack.c.bf16 %v83_v1, %v81_v59  ;;  %v85_v8 = vld [vmem:[#allocation3 + $0xe0] sm:$0xff]  ;;  %v534_v9 = vpack.c.bf16 %v199_v3, %v198_v2  ;;  %v87_v13 = vld [vmem:[#allocation3 + $0xf0] sm:$0xff] }
  0x38   :  { %503 = vmatprep.subr.bf16.mxu0 %v502_v36  ;;  %v182_v10 = vld [vmem:[#allocation6 + $0x40] sm:$0xff]  ;;  %v183_v11 = vld [vmem:[#allocation6 + $0x48] sm:$0xff]  ;;  %v514_v12 = vpack.c.bf16 %v88_v5, %v86_v4  ;;  %v200_v14 = vld [vmem:[#allocation6 + $0xd0] sm:$0xff]  ;;  %v516_v17 = vpack.c.bf16 %v87_v13, %v85_v8  ;;  %v93_v56 = vsub.s32 0, %v92_v55 }
  0x39   :  { %v201_v15 = vld [vmem:[#allocation6 + $0xd8] sm:$0xff]  ;;  %v536_v16 = vpack.c.bf16 %v183_v11, %v182_v10  ;;  %v184_v19 = vld [vmem:[#allocation6 + $0x50] sm:$0xff]  ;;  %v202_v21 = vld [vmem:[#allocation6 + $0xe0] sm:$0xff] }
  0x3a   :  { %529 = vmatpush3.bf16.msra.mxu1 %v528_v57  ;;  %v538_v18 = vpack.c.bf16 %v201_v15, %v200_v14  ;;  %v185_v20 = vld [vmem:[#allocation6 + $0x58] sm:$0xff]  ;;  %v203_v22 = vld [vmem:[#allocation6 + $0xe8] sm:$0xff]  ;;  %v56_v24 = vld [vmem:[%s813_s0] sm:$0xff] }
  0x3b   :  { %505 = vmatpush1.bf16.msra.mxu0 %v504_v46  ;;  %531 = vmatprep.subr.bf16.mxu1 %v530_v60  ;;  %v540_v23 = vpack.c.bf16 %v185_v20, %v184_v19  ;;  %v542_v25 = vpack.c.bf16 %v203_v22, %v202_v21  ;;  %v186_v26 = vld [vmem:[#allocation6 + $0x60] sm:$0xff]  ;;  %v187_v27 = vld [vmem:[#allocation6 + $0x68] sm:$0xff]  ;;  %v204_v29 = vld [vmem:[#allocation6 + $0xf0] sm:$0xff] }
  0x3c   :  { %507 = vmatprep.subr.bf16.mxu0 %v506_v51  ;;  %v544_v28 = vpack.c.bf16 %v187_v27, %v186_v26  ;;  %v205_v30 = vld [vmem:[#allocation6 + $0xf8] sm:$0xff]  ;;  %v188_v32 = vld [vmem:[#allocation6 + $0x70] sm:$0xff]  ;;  %v284_v35 = vld [vmem:[%s818_s5] sm:$0xff] }
  0x3d   :  { %v546_v31 = vpack.c.bf16 %v205_v30, %v204_v29  ;;  %v189_v33 = vld [vmem:[#allocation6 + $0x78] sm:$0xff]  ;;  %v285_v36 = vld [vmem:[%s818_s5 + $0x8] sm:$0xff]  ;;  %v286_v37 = vld [vmem:[%s818_s5 + $0x10] sm:$0xff] }
  0x3e   :  { %533 = vmatpush3.bf16.msra.mxu1 %v532_v6  ;;  %v548_v34 = vpack.c.bf16 %v189_v33, %v188_v32  ;;  %v551_v39 = vpack.c.bf16 %v285_v36, %v284_v35  ;;  %v287_v40 = vld [vmem:[%s818_s5 + $0x18] sm:$0xff]  ;;  %v288_v42 = vld [vmem:[%s818_s5 + $0x20] sm:$0xff]  ;;  %v289_v43 = vld [vmem:[%s818_s5 + $0x28] sm:$0xff] }
  0x3f   :  { %509 = vmatpush1.bf16.msra.mxu0 %v508_v58  ;;  %535 = vmatprep.subr.bf16.mxu1 %v534_v9  ;;  %v554_v41 = vpack.c.bf16 %v287_v40, %v286_v37  ;;  %v557_v44 = vpack.c.bf16 %v289_v43, %v288_v42  ;;  %v290_v45 = vld [vmem:[%s818_s5 + $0x30] sm:$0xff]  ;;  %v291_v46 = vld [vmem:[%s818_s5 + $0x38] sm:$0xff]  ;;  %v292_v48 = vld [vmem:[%s818_s5 + $0x40] sm:$0xff]  ;;  %v97_v58 = vsub.s32 1, %v92_v55 }
  0x40   :  { %511 = vmatprep.subr.bf16.mxu0 %v510_v63  ;;  %v560_v47 = vpack.c.bf16 %v291_v46, %v290_v45  ;;  %v293_v49 = vld [vmem:[%s818_s5 + $0x48] sm:$0xff]  ;;  %v294_v51 = vld [vmem:[%s818_s5 + $0x50] sm:$0xff]  ;;  %v295_v52 = vld [vmem:[%s818_s5 + $0x58] sm:$0xff] }
  0x41   :  { %v563_v50 = vpack.c.bf16 %v293_v49, %v292_v48  ;;  %v566_v53 = vpack.c.bf16 %v295_v52, %v294_v51  ;;  %v89_v57 = vld [vmem:[%s815_s2] sm:$0x3]  ;;  %v297_v5 = vld [vmem:[%s818_s5 + $0x68] sm:$0xff]  ;;  %v299_v8 = vld [vmem:[%s818_s5 + $0x78] sm:$0xff] }
  0x42   :  { %537 = vmatpush3.bf16.msra.mxu1 %v536_v16  ;;  %v94_v59 = vrot.slane %v89_v57, %v93_v56  ;;  %v98_v60 = vrot.slane %v89_v57, %v97_v58  ;;  %v296_v4 = vld [vmem:[%s818_s5 + $0x60] sm:$0xff]  ;;  %v301_v16 = vstv %s819_s6 }
  0x43   :  { %513 = vmatpush1.bf16.msra.mxu0 %v512_v7  ;;  %539 = vmatprep.subr.bf16.mxu1 %v538_v18  ;;  %v569_v6 = vpack.c.bf16 %v297_v5, %v296_v4  ;;  %v298_v7 = vld [vmem:[%s818_s5 + $0x70] sm:$0xff]  ;;  %v398_v11 = vld [vmem:[%s817_s4] ss:$0 sm:$0xff] }
  0x44   :  { %515 = vmatprep.subr.bf16.mxu0 %v514_v12  ;;  %v572_v9 = vpack.c.bf16 %v299_v8, %v298_v7 }
  0x46   :  { %541 = vmatpush3.bf16.msra.mxu1 %v540_v23 }
  0x47   :  { %517 = vmatpush1.bf16.msra.mxu0 %v516_v17  ;;  %543 = vmatprep.subr.bf16.mxu1 %v542_v25 }
  0x48   :  { %550 = vmatprep.subr.bf16.mxu0 %v668_v38 }
  0x4a   :  { %166 = vmatmul.mubr.f32.vlgmr.msra.gmra.mrb[0].mxu0 %v56_v24  ;;  %545 = vmatpush3.bf16.msra.mxu1 %v544_v28 }
  0x4b   :  { %547 = vmatprep.subr.bf16.mxu1 %v546_v31  ;;  %552 = vmatpush3.bf16.msra.mxu0 %v551_v39 }
  0x4c   :  { %553 = vmatprep.subr.bf16.mxu0 %v668_v38  ;;  %483 = vmatprep.mubr.msk.f32.mxu0 %vm669_vm0, %v667_v0 }
  0x4e   :  { %549 = vmatpush3.bf16.msra.mxu1 %v548_v34 }
  0x4f   :  { %555 = vmatpush3.bf16.msra.mxu0 %v554_v41 }
  0x50   :  { %556 = vmatprep.subr.bf16.mxu0 %v668_v38 }
  0x53   :  { %558 = vmatpush3.bf16.msra.mxu0 %v557_v44 }
  0x54   :  { %559 = vmatprep.subr.bf16.mxu0 %v668_v38 }
  0x57   :  { %561 = vmatpush3.bf16.msra.mxu0 %v560_v47 }
  0x58   :  { %562 = vmatprep.subr.bf16.mxu0 %v668_v38 }
  0x5b   :  { %564 = vmatpush3.bf16.msra.mxu0 %v563_v50 }
  0x5c   :  { %565 = vmatprep.subr.bf16.mxu0 %v668_v38 }
  0x5f   :  { %567 = vmatpush3.bf16.msra.mxu0 %v566_v53 }
  0x60   :  { %568 = vmatprep.subr.bf16.mxu0 %v668_v38 }
  0x63   :  { %570 = vmatpush3.bf16.msra.mxu0 %v569_v6 }
  0x64   :  { %571 = vmatprep.subr.bf16.mxu0 %v668_v38 }
  0x67   :  { %573 = vmatpush3.bf16.msra.mxu0 %v572_v9 }
 0x11d   :  { %v167_v61 = vpop.f32.mrb[0].mxu0 }
 0x11e   :  { %v168_v62 = vadd.f32 %v167_v61, %v94_v59  ;;  %v169_v63 = vpop.f32.mrb[1].mxu0 }
 0x11f   :  { %v170_v1 = vadd.f32 %v169_v63, %v98_v60 }
 0x120   :  { %v172_v3 = vmax.f32 %v168_v62, 0.0 }
 0x121   :  { %v173_v2 = vmax.f32 %v170_v1, 0.0 }
 0x123   :  { %277 = vmatprep.mubr.f32.mxu1 %v173_v2 }
 0x124   :  { %278 = vmatmul.mubr.f32.vlgmr.msra.gmra.mrb[0].mxu1 %v172_v3 }
 0x1f7   :  { %v431_v10 = vpop.f32.mrb[0].mxu1 }
 0x1f8   :  { %v432_v12 = vpop.f32.mrb[1].mxu1 }
 0x1f9   :  { %v433_v13 = vadd.f32 %v432_v12, %v431_v10 }
 0x1fb   :  { %v280_v14 = vadd.f32 %v433_v13, %v398_v11 }
 0x1fd   :  { %v283_v15 = vmax.f32 %v280_v14, 0.0 }
 0x1ff   :  { %484 = vmatmul.mubr.f32.vlgmr.msra.gmra.mrb[2].mxu0 %v283_v15 }
 0x2d2   :  { %v368_v17 = vpop.f32.mrb[2].mxu0 }
 0x2d3   :  { %v369_v18 = vadd.f32 %v368_v17, %v301_v16  ;;  %v485_v19 = vpop.f32.mrb[3].mxu0 }
 0x2d5   :  { %v372_v20 = vsub.f32 0.0, %v369_v18 }
 0x2d7   :  { %v373_v21 = vmul.f32 1.442695, %v372_v20 }
 0x2d9   :  { %585 = vpow2.f32 %v373_v21 }
 0x2e3   :  { %v586_v0 = vpop.eup %585 }
 0x2e4   :  { %v375_v22 = vadd.f32 1.0, %v586_v0 }
 0x2e6   :  { %587 = vrcp.f32 %v375_v22 }
 0x2f0   :  { %v588_v23 = vpop.eup %587 }
 0x2f1   :  { %379 = vst.msk [vmem:[#allocation8] sm:$0xff] %vm378_vm1, %v588_v23 }
 0x2f2   :  { %384 = vsyncadd [#allocation5], 112  ;;  %s670_s4 = smov [#allocation8]  }
 0x2f3   :  { %s385_s5 = sshll.u32 %s670_s4, 4  ;;  %s386_s5 = int_to_ptr.vmem [resolvable:$true] %s385_s5 }
 0x2f4   :  { %s633_s18 = scalar_lea.vmem %s386_s5, 16  ;;  %s637_s19 = scalar_lea.vmem %s386_s5, 128 }
 0x2f5   :  { %p634_p2 = scmp.ne.s32.totalorder %s386_s5, %s633_s18  ;;  %p638_p3 = scmp.lt.s32.totalorder %s386_s5, %s386_s5 }
 0x2f6   :  { %p639_p4 = scmp.lt.s32.totalorder %s637_s19, %s633_s18 }
 0x2f8   :  { %p640_p5 = por %p639_p4, %p638_p3 }
 0x2fa   :  { %p641_p6 = pnand %p640_p5, %p634_p2 }
 0x2fc   :  { %644 = shalt.err (!%p641_p6)
}
 0x2fd   :  { %s645_s21 = scalar_lea.hbm %s820_s7, 16 }
 0x2fe   :  { %p646_p7 = scmp.ne.s32.totalorder %s820_s7, %s645_s21  ;;  %p649_p8 = scmp.lt.u32.totalorder %s645_s21, %s820_s7 }
 0x300   :  { %p651_p9 = pnand %p649_p8, %p646_p7 }
 0x302   :  { %654 = shalt.err (!%p651_p9)
}
 0x303   :  { %s671_s25 = smov 1  }
 0x304   :  { %391 = dma.vmem_to_hbm [thread:$0]  %s386_s5, 16, %s820_s7, [#allocation5], %s663_s12, %s663_s12, %s671_s25  }
 0x305   :  { %659 = dma.done.wait [#allocation5], 128  }
 0x306   :  { %660 = vsyncadd [#allocation5], 4294967168 }
 0x307   :  { %395 = vsyncpa [#allocation4], 1 }
 0x308   :  { %396 = vsyncpa [#allocation7], 1 }
 0x309   :  { %397 = vsyncpa [#allocation5], 1 }

</bundles_post_ra>
